<compile_context>
chip_gen: v7x
topology: tpu7x:2x2x1
jax: 0.10.0
libtpu: 0.0.40
codegen_flags: <defaults>
</compile_context>

<pallas_src>
import jax
import jax.numpy as jnp
from jax import lax
from jax.experimental import pallas as pl
from jax.experimental.pallas import tpu as pltpu


# ---------------------------------------------------------------------------
# Pallas kernel: one RNN layer's serial recurrence over a T-chunk.
# ---------------------------------------------------------------------------
def rnn_recurrence_kernel(xproj_ref, w_hh_ref, h0_ref, out_ref, h_carry):
    """Serial tanh-RNN recurrence for one layer, one (batch, T)-chunk.

    xproj_ref: (Tc, Bc, H)  precomputed x_t @ W_ih + (b_ih + b_hh)  (streamed)
    w_hh_ref:  (H, H)       recurrent weight (resident across all chunks)
    h0_ref:    (Bc, H)      initial hidden state for this batch block
    out_ref:   (Tc, Bc, H)  hidden states for this chunk (streamed out)
    h_carry:   (Bc, H)      VMEM scratch carrying h across T-chunks
    """
    # Initialize the carry from the learnable h0 on the first T-chunk only.
    @pl.when(pl.program_id(1) == 0)
    def _():
        h_carry[...] = h0_ref[...]

    w_hh = w_hh_ref[...]                       # hoisted out of the loop
    t_chunk = xproj_ref.shape[0]

    def step(t, h):
        # Only the recurrent matmul + tanh live on the serial critical path;
        # input projection and bias were folded into xproj outside the kernel.
        h_new = jnp.tanh(
            xproj_ref[t]
            + jnp.dot(h, w_hh, preferred_element_type=jnp.float32))
        out_ref[t] = h_new
        return h_new

    # Short, fixed trip count -> fully unroll for LLO scheduling visibility.
    h_carry[...] = lax.fori_loop(0, t_chunk, step, h_carry[...], unroll=True)


# ---------------------------------------------------------------------------
# Wrapper helpers
# ---------------------------------------------------------------------------
def _round_up(n, m):
    return ((n + m - 1) // m) * m


def _pad_to(a, shape):
    pads = [(0, s - d) for d, s in zip(a.shape, shape)]
    if all(p == (0, 0) for p in pads):
        return a
    return jnp.pad(a, pads)


def _largest_divisor_leq(n, cap):
    for c in range(min(n, cap), 0, -1):
        if n % c == 0:
            return c
    return 1


def _rnn_layer_recurrence(xproj, w_hh, h0):
    """Run one layer's recurrence with Pallas, streaming over T-chunks."""
    T, B, H = xproj.shape
    t_chunk = _largest_divisor_leq(T, 32)      # chunk of timesteps per grid step
    b_chunk = B                                # TODO(synk): shard batch across the
    # two v7x TensorCores (parallel axis) once B is a multiple of 8 per block.
    grid = (B // b_chunk, T // t_chunk)

    return pl.pallas_call(
        rnn_recurrence_kernel,
        out_shape=jax.ShapeDtypeStruct((T, B, H), jnp.float32),
        grid_spec=pltpu.PrefetchScalarGridSpec(
            num_scalar_prefetch=0,
            grid=grid,
            in_specs=[
                pl.BlockSpec((t_chunk, b_chunk, H), lambda b, t: (t, b, 0)),
                pl.BlockSpec((H, H), lambda b, t: (0, 0)),
                pl.BlockSpec((b_chunk, H), lambda b, t: (b, 0)),
            ],
            out_specs=pl.BlockSpec((t_chunk, b_chunk, H), lambda b, t: (t, b, 0)),
            scratch_shapes=[pltpu.VMEM((b_chunk, H), jnp.float32)],
        ),
        compiler_params=pltpu.CompilerParams(
            dimension_semantics=("parallel", "arbitrary"),
            vmem_limit_bytes=32 * 1024 * 1024),
    )(xproj, w_hh, h0)


# ---------------------------------------------------------------------------
# Forward pass (matches RNN.forward of the PyTorch module)
# ---------------------------------------------------------------------------
def rnn_forward(x, params):
    """x: (B, T) int32 token ids -> logits (B, T, V)."""
    emb_table = params["embedding"]          # (V, E)
    w_ih0 = params["w_ih0"]                  # (E, H)
    w_ih_rest = params["w_ih_rest"]          # (max(L-1,1), H, H)
    w_hh = params["w_hh"]                    # (L, H, H)
    b = params["b"]                          # (L, 1, H)  (= b_ih + b_hh)
    h0 = params["h0"]                        # (L, 1, H)  learnable init hidden
    fcw = params["fcw"]                      # (H, V)
    fcb = params["fcb"]                      # (1, V)

    B, T = x.shape
    V, E = emb_table.shape
    L, _, H = w_hh.shape

    LANE = 128
    e_pad = _round_up(E, LANE)
    h_pad = _round_up(H, LANE)
    v_pad = _round_up(V, LANE)

    # Embedding gather + batch_first -> time-major (glue, XLA).
    emb = jnp.take(emb_table, x, axis=0)                  # (B, T, E)
    layer_in = _pad_to(jnp.transpose(emb, (1, 0, 2)), (T, B, e_pad))

    # `self.h.expand(-1, B, -1)` + lane padding (padded hidden dims stay 0).
    h0_b = _pad_to(jnp.broadcast_to(h0, (L, B, H)).astype(jnp.float32),
                   (L, B, h_pad))

    for l in range(L):
        w_ih = w_ih0 if l == 0 else w_ih_rest[l - 1]
        in_dim = e_pad if l == 0 else h_pad
        w_ih_p = _pad_to(w_ih, (in_dim, h_pad))
        b_p = _pad_to(b[l], (1, h_pad))

        # Hoisted non-recurrent work: one big GEMM over all T*B rows + bias.
        xproj = jnp.einsum("tbe,eh->tbh", layer_in, w_ih_p) + b_p   # (T,B,Hp)

        # Serial part in Pallas (h @ W_hh + xproj[t] -> tanh).
        layer_in = _rnn_layer_recurrence(
            xproj, _pad_to(w_hh[l], (h_pad, h_pad)), h0_b[l])

    # FC head: one big (T*B, H) @ (H, V) GEMM (XLA), then slice off padding.
    fcw_p = _pad_to(fcw, (h_pad, v_pad))
    fcb_p = _pad_to(fcb, (1, v_pad))
    logits_tm = jnp.einsum("tbh,hv->tbv", layer_in, fcw_p) + fcb_p  # (T,B,Vp)
    return jnp.transpose(logits_tm, (1, 0, 2))[..., :V]             # (B,T,V)


# ---------------------------------------------------------------------------
# Parameters + pure-JAX reference (torch-semantics mirror)
# ---------------------------------------------------------------------------
def init_params(key, num_features, hidden_units, num_layers, embedding_dim):
    """Deterministic synthetic parameters matching the nn.Module's shapes."""
    V, H, L, E = num_features, hidden_units, num_layers, embedding_dim
    keys = jax.random.split(key, 8)
    k = 1.0 / jnp.sqrt(jnp.float32(H))
    embedding = jax.random.normal(keys[0], (V, E), jnp.float32)
    w_ih0 = jax.random.uniform(keys[1], (E, H), jnp.float32, -k, k)
    n_rest = max(L - 1, 1)
    w_ih_rest = jax.random.uniform(keys[2], (n_rest, H, H), jnp.float32, -k, k)
    w_hh = jax.random.uniform(keys[3], (L, H, H), jnp.float32, -k, k)
    b_ih = jax.random.uniform(keys[4], (L, 1, H), jnp.float32, -k, k)
    b_hh = jax.random.uniform(keys[5], (L, 1, H), jnp.float32, -k, k)
    fcw = jax.random.uniform(keys[6], (H, V), jnp.float32, -k, k)
    fcb = jax.random.uniform(keys[7], (1, V), jnp.float32, -k, k)
    h0 = jnp.zeros((L, 1, H), jnp.float32)   # nn.Parameter(torch.zeros(L,1,H))
    return dict(embedding=embedding, w_ih0=w_ih0, w_ih_rest=w_ih_rest,
                w_hh=w_hh, b=b_ih + b_hh, h0=h0, fcw=fcw, fcb=fcb)


def rnn_forward_ref(x, params):
    """Pure-JAX reference (mirrors torch semantics) for a correctness check."""
    emb = jnp.take(params["embedding"], x, axis=0)       # (B, T, E)
    B, T, _ = emb.shape
    L, _, H = params["w_hh"].shape
    h0 = jnp.broadcast_to(params["h0"], (L, B, H))
    layer_in = emb
    for l in range(L):
        w_ih = params["w_ih0"] if l == 0 else params["w_ih_rest"][l - 1]
        hl = h0[l]
        outs = []
        for t in range(T):
            hl = jnp.tanh(layer_in[:, t] @ w_ih
                          + hl @ params["w_hh"][l]
                          + params["b"][l])
            outs.append(hl)
        layer_in = jnp.stack(outs, axis=1)               # (B, T, H)
    return layer_in @ params["fcw"] + params["fcb"]      # (B, T, V)


if __name__ == "__main__":
    import numpy as np

    B, T = 2, 8                 # batch, sequence length
    V, H, L, E = 64, 32, 2, 32  # num_features, hidden_units, num_layers, embedding_dim

    key = jax.random.PRNGKey(0)
    kp, kx = jax.random.split(key)
    params = init_params(kp, V, H, L, E)
    x = jax.random.randint(kx, (B, T), 0, V, dtype=jnp.int32)

    y = jax.block_until_ready(jax.jit(rnn_forward)(x, params))
    assert y.shape == (B, T, V) and y.dtype == jnp.float32

    y_ref = rnn_forward_ref(x, params)
    np.testing.assert_allclose(np.asarray(y), np.asarray(y_ref),
                               rtol=1e-4, atol=1e-4)
    print("KERNEL_OK")
</pallas_src>

<mosaic_0001>
module attributes {stable_mosaic.version = 11 : i64} {
  func.func @rnn_recurrence_kernel(%arg0: i32, %arg1: i32, %arg2: memref<8x2x128xf32, #tpu.memory_space<vmem>>, %arg3: memref<128x128xf32, #tpu.memory_space<vmem>>, %arg4: memref<2x128xf32, #tpu.memory_space<vmem>>, %arg5: memref<8x2x128xf32, #tpu.memory_space<vmem>>, %arg6: memref<2x128xf32, #tpu.memory_space<vmem>>) attributes {dimension_semantics = [#tpu.dimension_semantics<parallel>, #tpu.dimension_semantics<arbitrary>], iteration_bounds = array<i64: 1, 1>, scalar_prefetch = 0 : i64, scratch_operands = 1 : i64, tpu.core_type = #tpu.core_type<tc>, window_params = [{transform_indices = @transform_0, window_bounds = array<i64: 8, 2, 128>}, {pipeline_mode = #tpu.pipeline_mode<synchronous>, transform_indices = @transform_1, window_bounds = array<i64: 128, 128>}, {transform_indices = @transform_2, window_bounds = array<i64: 2, 128>}, {transform_indices = @transform_3, window_bounds = array<i64: 8, 2, 128>}]} {
    %c0_i32 = arith.constant 0 : i32
    %0 = arith.cmpi eq, %arg1, %c0_i32 : i32
    %1 = arith.extui %0 : i1 to i32
    %c0_i32_0 = arith.constant 0 : i32
    %2 = arith.cmpi ne, %1, %c0_i32_0 : i32
    scf.if %2 {
      %c0_46 = arith.constant 0 : index
      %c0_47 = arith.constant 0 : index
      %86 = vector.load %arg4[%c0_46, %c0_47] : memref<2x128xf32, #tpu.memory_space<vmem>>, vector<2x128xf32>
      %c0_48 = arith.constant 0 : index
      %c0_49 = arith.constant 0 : index
      %87 = vector.load %arg6[%c0_48, %c0_49] : memref<2x128xf32, #tpu.memory_space<vmem>>, vector<2x128xf32>
      tpu.vector_store %arg6[%c0_48, %c0_49], %86 {strides = array<i32>} : memref<2x128xf32, #tpu.memory_space<vmem>>, vector<2x128xf32>,
    } else {
    }
    %c0 = arith.constant 0 : index
    %c0_1 = arith.constant 0 : index
    %3 = vector.load %arg3[%c0, %c0_1] : memref<128x128xf32, #tpu.memory_space<vmem>>, vector<128x128xf32>
    %c0_2 = arith.constant 0 : index
    %c0_3 = arith.constant 0 : index
    %4 = vector.load %arg6[%c0_2, %c0_3] : memref<2x128xf32, #tpu.memory_space<vmem>>, vector<2x128xf32>
    %c0_i32_4 = arith.constant 0 : i32
    %5 = arith.index_cast %c0_i32_4 : i32 to index
    %c0_5 = arith.constant 0 : index
    %c0_6 = arith.constant 0 : index
    %6 = vector.load %arg2[%5, %c0_5, %c0_6] : memref<8x2x128xf32, #tpu.memory_space<vmem>>, vector<1x2x128xf32>
    %7 = vector.shape_cast %6 : vector<1x2x128xf32> to vector<2x128xf32>
    %cst = arith.constant dense<0.000000e+00> : vector<2x128xf32>
    %8 = tpu.matmul %4, %3, %cst {dimension_numbers = #tpu.dot_dimension_numbers<[1], [0], [0], [1], [0, 0, 1, 1], [], []>} : vector<2x128xf32>, vector<128x128xf32>, vector<2x128xf32> -> vector<2x128xf32>
    %9 = arith.addf %7, %8 : vector<2x128xf32>
    %10 = math.tanh %9 : vector<2x128xf32>
    %11 = arith.index_cast %c0_i32_4 : i32 to index
    %c0_7 = arith.constant 0 : index
    %c0_8 = arith.constant 0 : index
    %12 = vector.load %arg5[%11, %c0_7, %c0_8] : memref<8x2x128xf32, #tpu.memory_space<vmem>>, vector<1x2x128xf32>
    %13 = vector.shape_cast %12 : vector<1x2x128xf32> to vector<2x128xf32>
    %14 = vector.shape_cast %10 : vector<2x128xf32> to vector<1x2x128xf32>
    tpu.vector_store %arg5[%11, %c0_7, %c0_8], %14 {strides = array<i32>} : memref<8x2x128xf32, #tpu.memory_space<vmem>>, vector<1x2x128xf32>,
    %c1_i32 = arith.constant 1 : i32
    %15 = arith.index_cast %c1_i32 : i32 to index
    %c0_9 = arith.constant 0 : index
    %c0_10 = arith.constant 0 : index
    %16 = vector.load %arg2[%15, %c0_9, %c0_10] : memref<8x2x128xf32, #tpu.memory_space<vmem>>, vector<1x2x128xf32>
    %17 = vector.shape_cast %16 : vector<1x2x128xf32> to vector<2x128xf32>
    %cst_11 = arith.constant dense<0.000000e+00> : vector<2x128xf32>
    %18 = tpu.matmul %10, %3, %cst_11 {dimension_numbers = #tpu.dot_dimension_numbers<[1], [0], [0], [1], [0, 0, 1, 1], [], []>} : vector<2x128xf32>, vector<128x128xf32>, vector<2x128xf32> -> vector<2x128xf32>
    %19 = arith.addf %17, %18 : vector<2x128xf32>
    %20 = math.tanh %19 : vector<2x128xf32>
    %21 = arith.index_cast %c1_i32 : i32 to index
    %c0_12 = arith.constant 0 : index
    %c0_13 = arith.constant 0 : index
    %22 = vector.load %arg5[%21, %c0_12, %c0_13] : memref<8x2x128xf32, #tpu.memory_space<vmem>>, vector<1x2x128xf32>
    %23 = vector.shape_cast %22 : vector<1x2x128xf32> to vector<2x128xf32>
    %24 = vector.shape_cast %20 : vector<2x128xf32> to vector<1x2x128xf32>
    tpu.vector_store %arg5[%21, %c0_12, %c0_13], %24 {strides = array<i32>} : memref<8x2x128xf32, #tpu.memory_space<vmem>>, vector<1x2x128xf32>,
    %c2_i32 = arith.constant 2 : i32
    %25 = arith.index_cast %c2_i32 : i32 to index
    %c0_14 = arith.constant 0 : index
    %c0_15 = arith.constant 0 : index
    %26 = vector.load %arg2[%25, %c0_14, %c0_15] : memref<8x2x128xf32, #tpu.memory_space<vmem>>, vector<1x2x128xf32>
    %27 = vector.shape_cast %26 : vector<1x2x128xf32> to vector<2x128xf32>
    %cst_16 = arith.constant dense<0.000000e+00> : vector<2x128xf32>
    %28 = tpu.matmul %20, %3, %cst_16 {dimension_numbers = #tpu.dot_dimension_numbers<[1], [0], [0], [1], [0, 0, 1, 1], [], []>} : vector<2x128xf32>, vector<128x128xf32>, vector<2x128xf32> -> vector<2x128xf32>
    %29 = arith.addf %27, %28 : vector<2x128xf32>
    %30 = math.tanh %29 : vector<2x128xf32>
    %31 = arith.index_cast %c2_i32 : i32 to index
    %c0_17 = arith.constant 0 : index
    %c0_18 = arith.constant 0 : index
    %32 = vector.load %arg5[%31, %c0_17, %c0_18] : memref<8x2x128xf32, #tpu.memory_space<vmem>>, vector<1x2x128xf32>
    %33 = vector.shape_cast %32 : vector<1x2x128xf32> to vector<2x128xf32>
    %34 = vector.shape_cast %30 : vector<2x128xf32> to vector<1x2x128xf32>
    tpu.vector_store %arg5[%31, %c0_17, %c0_18], %34 {strides = array<i32>} : memref<8x2x128xf32, #tpu.memory_space<vmem>>, vector<1x2x128xf32>,
    %c3_i32 = arith.constant 3 : i32
    %35 = arith.index_cast %c3_i32 : i32 to index
    %c0_19 = arith.constant 0 : index
    %c0_20 = arith.constant 0 : index
    %36 = vector.load %arg2[%35, %c0_19, %c0_20] : memref<8x2x128xf32, #tpu.memory_space<vmem>>, vector<1x2x128xf32>
    %37 = vector.shape_cast %36 : vector<1x2x128xf32> to vector<2x128xf32>
    %cst_21 = arith.constant dense<0.000000e+00> : vector<2x128xf32>
    %38 = tpu.matmul %30, %3, %cst_21 {dimension_numbers = #tpu.dot_dimension_numbers<[1], [0], [0], [1], [0, 0, 1, 1], [], []>} : vector<2x128xf32>, vector<128x128xf32>, vector<2x128xf32> -> vector<2x128xf32>
    %39 = arith.addf %37, %38 : vector<2x128xf32>
    %40 = math.tanh %39 : vector<2x128xf32>
    %41 = arith.index_cast %c3_i32 : i32 to index
    %c0_22 = arith.constant 0 : index
    %c0_23 = arith.constant 0 : index
    %42 = vector.load %arg5[%41, %c0_22, %c0_23] : memref<8x2x128xf32, #tpu.memory_space<vmem>>, vector<1x2x128xf32>
    %43 = vector.shape_cast %42 : vector<1x2x128xf32> to vector<2x128xf32>
    %44 = vector.shape_cast %40 : vector<2x128xf32> to vector<1x2x128xf32>
    tpu.vector_store %arg5[%41, %c0_22, %c0_23], %44 {strides = array<i32>} : memref<8x2x128xf32, #tpu.memory_space<vmem>>, vector<1x2x128xf32>,
    %c4_i32 = arith.constant 4 : i32
    %45 = arith.index_cast %c4_i32 : i32 to index
    %c0_24 = arith.constant 0 : index
    %c0_25 = arith.constant 0 : index
    %46 = vector.load %arg2[%45, %c0_24, %c0_25] : memref<8x2x128xf32, #tpu.memory_space<vmem>>, vector<1x2x128xf32>
    %47 = vector.shape_cast %46 : vector<1x2x128xf32> to vector<2x128xf32>
    %cst_26 = arith.constant dense<0.000000e+00> : vector<2x128xf32>
    %48 = tpu.matmul %40, %3, %cst_26 {dimension_numbers = #tpu.dot_dimension_numbers<[1], [0], [0], [1], [0, 0, 1, 1], [], []>} : vector<2x128xf32>, vector<128x128xf32>, vector<2x128xf32> -> vector<2x128xf32>
    %49 = arith.addf %47, %48 : vector<2x128xf32>
    %50 = math.tanh %49 : vector<2x128xf32>
    %51 = arith.index_cast %c4_i32 : i32 to index
    %c0_27 = arith.constant 0 : index
    %c0_28 = arith.constant 0 : index
    %52 = vector.load %arg5[%51, %c0_27, %c0_28] : memref<8x2x128xf32, #tpu.memory_space<vmem>>, vector<1x2x128xf32>
    %53 = vector.shape_cast %52 : vector<1x2x128xf32> to vector<2x128xf32>
    %54 = vector.shape_cast %50 : vector<2x128xf32> to vector<1x2x128xf32>
    tpu.vector_store %arg5[%51, %c0_27, %c0_28], %54 {strides = array<i32>} : memref<8x2x128xf32, #tpu.memory_space<vmem>>, vector<1x2x128xf32>,
    %c5_i32 = arith.constant 5 : i32
    %55 = arith.index_cast %c5_i32 : i32 to index
    %c0_29 = arith.constant 0 : index
    %c0_30 = arith.constant 0 : index
    %56 = vector.load %arg2[%55, %c0_29, %c0_30] : memref<8x2x128xf32, #tpu.memory_space<vmem>>, vector<1x2x128xf32>
    %57 = vector.shape_cast %56 : vector<1x2x128xf32> to vector<2x128xf32>
    %cst_31 = arith.constant dense<0.000000e+00> : vector<2x128xf32>
    %58 = tpu.matmul %50, %3, %cst_31 {dimension_numbers = #tpu.dot_dimension_numbers<[1], [0], [0], [1], [0, 0, 1, 1], [], []>} : vector<2x128xf32>, vector<128x128xf32>, vector<2x128xf32> -> vector<2x128xf32>
    %59 = arith.addf %57, %58 : vector<2x128xf32>
    %60 = math.tanh %59 : vector<2x128xf32>
    %61 = arith.index_cast %c5_i32 : i32 to index
    %c0_32 = arith.constant 0 : index
    %c0_33 = arith.constant 0 : index
    %62 = vector.load %arg5[%61, %c0_32, %c0_33] : memref<8x2x128xf32, #tpu.memory_space<vmem>>, vector<1x2x128xf32>
    %63 = vector.shape_cast %62 : vector<1x2x128xf32> to vector<2x128xf32>
    %64 = vector.shape_cast %60 : vector<2x128xf32> to vector<1x2x128xf32>
    tpu.vector_store %arg5[%61, %c0_32, %c0_33], %64 {strides = array<i32>} : memref<8x2x128xf32, #tpu.memory_space<vmem>>, vector<1x2x128xf32>,
    %c6_i32 = arith.constant 6 : i32
    %65 = arith.index_cast %c6_i32 : i32 to index
    %c0_34 = arith.constant 0 : index
    %c0_35 = arith.constant 0 : index
    %66 = vector.load %arg2[%65, %c0_34, %c0_35] : memref<8x2x128xf32, #tpu.memory_space<vmem>>, vector<1x2x128xf32>
    %67 = vector.shape_cast %66 : vector<1x2x128xf32> to vector<2x128xf32>
    %cst_36 = arith.constant dense<0.000000e+00> : vector<2x128xf32>
    %68 = tpu.matmul %60, %3, %cst_36 {dimension_numbers = #tpu.dot_dimension_numbers<[1], [0], [0], [1], [0, 0, 1, 1], [], []>} : vector<2x128xf32>, vector<128x128xf32>, vector<2x128xf32> -> vector<2x128xf32>
    %69 = arith.addf %67, %68 : vector<2x128xf32>
    %70 = math.tanh %69 : vector<2x128xf32>
    %71 = arith.index_cast %c6_i32 : i32 to index
    %c0_37 = arith.constant 0 : index
    %c0_38 = arith.constant 0 : index
    %72 = vector.load %arg5[%71, %c0_37, %c0_38] : memref<8x2x128xf32, #tpu.memory_space<vmem>>, vector<1x2x128xf32>
    %73 = vector.shape_cast %72 : vector<1x2x128xf32> to vector<2x128xf32>
    %74 = vector.shape_cast %70 : vector<2x128xf32> to vector<1x2x128xf32>
    tpu.vector_store %arg5[%71, %c0_37, %c0_38], %74 {strides = array<i32>} : memref<8x2x128xf32, #tpu.memory_space<vmem>>, vector<1x2x128xf32>,
    %c7_i32 = arith.constant 7 : i32
    %75 = arith.index_cast %c7_i32 : i32 to index
    %c0_39 = arith.constant 0 : index
    %c0_40 = arith.constant 0 : index
    %76 = vector.load %arg2[%75, %c0_39, %c0_40] : memref<8x2x128xf32, #tpu.memory_space<vmem>>, vector<1x2x128xf32>
    %77 = vector.shape_cast %76 : vector<1x2x128xf32> to vector<2x128xf32>
    %cst_41 = arith.constant dense<0.000000e+00> : vector<2x128xf32>
    %78 = tpu.matmul %70, %3, %cst_41 {dimension_numbers = #tpu.dot_dimension_numbers<[1], [0], [0], [1], [0, 0, 1, 1], [], []>} : vector<2x128xf32>, vector<128x128xf32>, vector<2x128xf32> -> vector<2x128xf32>
    %79 = arith.addf %77, %78 : vector<2x128xf32>
    %80 = math.tanh %79 : vector<2x128xf32>
    %81 = arith.index_cast %c7_i32 : i32 to index
    %c0_42 = arith.constant 0 : index
    %c0_43 = arith.constant 0 : index
    %82 = vector.load %arg5[%81, %c0_42, %c0_43] : memref<8x2x128xf32, #tpu.memory_space<vmem>>, vector<1x2x128xf32>
    %83 = vector.shape_cast %82 : vector<1x2x128xf32> to vector<2x128xf32>
    %84 = vector.shape_cast %80 : vector<2x128xf32> to vector<1x2x128xf32>
    tpu.vector_store %arg5[%81, %c0_42, %c0_43], %84 {strides = array<i32>} : memref<8x2x128xf32, #tpu.memory_space<vmem>>, vector<1x2x128xf32>,
    %c8_i32 = arith.constant 8 : i32
    %c0_44 = arith.constant 0 : index
    %c0_45 = arith.constant 0 : index
    %85 = vector.load %arg6[%c0_44, %c0_45] : memref<2x128xf32, #tpu.memory_space<vmem>>, vector<2x128xf32>
    tpu.vector_store %arg6[%c0_44, %c0_45], %80 {strides = array<i32>} : memref<2x128xf32, #tpu.memory_space<vmem>>, vector<2x128xf32>,
    return
  }
  func.func @transform_0(%arg0: i32, %arg1: i32) -> (i32, i32, i32) {
    %c0_i32 = arith.constant 0 : i32
    %c0_i32_0 = arith.constant 0 : i32
    return %arg1, %arg0, %c0_i32 : i32, i32, i32
  }
  func.func @transform_1(%arg0: i32, %arg1: i32) -> (i32, i32) {
    %c0_i32 = arith.constant 0 : i32
    %c0_i32_0 = arith.constant 0 : i32
    %c0_i32_1 = arith.constant 0 : i32
    return %c0_i32, %c0_i32_0 : i32, i32
  }
  func.func @transform_2(%arg0: i32, %arg1: i32) -> (i32, i32) {
    %c0_i32 = arith.constant 0 : i32
    %c0_i32_0 = arith.constant 0 : i32
    return %arg0, %c0_i32 : i32, i32
  }
  func.func @transform_3(%arg0: i32, %arg1: i32) -> (i32, i32, i32) {
    %c0_i32 = arith.constant 0 : i32
    %c0_i32_0 = arith.constant 0 : i32
    return %arg1, %arg0, %c0_i32 : i32, i32, i32
  }
}

</mosaic_0001>

<bundles_post_ra>
// kernel: rnn_forward.2
= control target key start
LH: loop header
LB: loop body
LE: loop exit
PB: predicated region body
PF: predicated region fallthrough
CT: control target
= control target key end

     0   :  { %v1289_v0 = vmov 0.0|0.0   ;;  %vm1290_vm0 = vmmov 0   ;;  %v1291_v4 = vmov 0.0   ;;  %s1571_s1 = inlined_call_operand.vmem [shape: f32[128,128], index: 1, kind: input, shape index: {}]   ;;  %s1572_s2 = inlined_call_operand.vmem [shape: f32[2,128], index: 2, kind: input, shape index: {}]   ;;  %s1573_s0 = inlined_call_operand.vmem [shape: f32[8,2,128], index: 0, kind: input, shape index: {}]   ;;  %s1574_s3 = inlined_call_operand.vmem [shape: f32[8,2,128], index: 3, kind: output, shape index: {}]  }
   0x1   :  { %1078 = vmatprep.subr.bf16.mxu0 %v1289_v0  ;;  %v20_v1 = vld [vmem:[%s1571_s1] sm:$0xff]  ;;  %v21_v2 = vld [vmem:[%s1571_s1 + $0x8] sm:$0xff]  ;;  %v22_v3 = vld [vmem:[%s1571_s1 + $0x10] sm:$0xff]  ;;  %830 = vmatprep.mubr.msk.f32.mxu0 %vm1290_vm0, %v1291_v4 }
   0x2   :  { %v1324_v5 = vpack.c.bf16 %v21_v2, %v20_v1  ;;  %v23_v6 = vld [vmem:[%s1571_s1 + $0x18] sm:$0xff]  ;;  %1102 = vmatprep.subr.bf16.mxu1 %v1289_v0  ;;  %865 = vmatprep.mubr.msk.f32.mxu1 %vm1290_vm0, %v1291_v4  ;;  %v24_v8 = vld [vmem:[%s1571_s1 + $0x20] sm:$0xff]  ;;  %v25_v9 = vld [vmem:[%s1571_s1 + $0x28] sm:$0xff] }
   0x3   :  { %v1333_v7 = vpack.c.bf16 %v23_v6, %v22_v3  ;;  %v18_v10 = vld [vmem:[%s1572_s2] sm:$0x3]  ;;  %v1348_v11 = vpack.c.bf16 %v25_v9, %v24_v8  ;;  %v26_v12 = vld [vmem:[%s1571_s1 + $0x30] sm:$0xff]  ;;  %v27_v13 = vld [vmem:[%s1571_s1 + $0x38] sm:$0xff] }
   0x4   :  { %1080 = vmatpush3.bf16.msra.mxu0 %v1324_v5  ;;  %1104 = vmatpush3.bf16.msra.mxu1 %v1324_v5  ;;  %19 = vst [vmem:[#allocation2] sm:$0x3] %v18_v10  ;;  %v1360_v14 = vpack.c.bf16 %v27_v13, %v26_v12  ;;  %v28_v15 = vld [vmem:[%s1571_s1 + $0x40] sm:$0xff]  ;;  %v29_v16 = vld [vmem:[%s1571_s1 + $0x48] sm:$0xff]  ;;  %v30_v18 = vld [vmem:[%s1571_s1 + $0x50] sm:$0xff] }
   0x5   :  { %1081 = vmatprep.subr.bf16.mxu0 %v1289_v0  ;;  %1105 = vmatprep.subr.bf16.mxu1 %v1289_v0  ;;  %v1372_v17 = vpack.c.bf16 %v29_v16, %v28_v15  ;;  %v31_v19 = vld [vmem:[%s1571_s1 + $0x58] sm:$0xff]  ;;  %v32_v21 = vld [vmem:[%s1571_s1 + $0x60] sm:$0xff]  ;;  %v33_v22 = vld [vmem:[%s1571_s1 + $0x68] sm:$0xff] }
   0x6   :  { %v1384_v20 = vpack.c.bf16 %v31_v19, %v30_v18  ;;  %v1396_v23 = vpack.c.bf16 %v33_v22, %v32_v21  ;;  %v34_v24 = vld [vmem:[%s1571_s1 + $0x70] sm:$0xff]  ;;  %v35_v25 = vld [vmem:[%s1571_s1 + $0x78] sm:$0xff]  ;;  %v37_v28 = vld [vmem:[%s1573_s0] sm:$0x3] }
   0x7   :  { %v1408_v26 = vpack.c.bf16 %v35_v25, %v34_v24  ;;  %v648_v33 = vld [vmem:[%s1573_s0 + $0x2] sm:$0x3]  ;;  %v650_v38 = vld [vmem:[%s1573_s0 + $0x4] sm:$0x3]  ;;  %v652_v43 = vld [vmem:[%s1573_s0 + $0x6] sm:$0x3] }
   0x8   :  { %1083 = vmatpush3.bf16.msra.mxu0 %v1333_v7  ;;  %1107 = vmatpush3.bf16.msra.mxu1 %v1333_v7  ;;  %v654_v48 = vld [vmem:[%s1573_s0 + $0x8] sm:$0x3]  ;;  %v656_v53 = vld [vmem:[%s1573_s0 + $0xa] sm:$0x3]  ;;  %v658_v58 = vld [vmem:[%s1573_s0 + $0xc] sm:$0x3] }
   0x9   :  { %1084 = vmatprep.subr.bf16.mxu0 %v1289_v0  ;;  %1108 = vmatprep.subr.bf16.mxu1 %v1289_v0  ;;  %v660_v63 = vld [vmem:[%s1573_s0 + $0xe] sm:$0x3] }
   0xb   :  { %v36_v27 = vld [vmem:[#allocation2] sm:$0x3] }
   0xc   :  { %1086 = vmatpush3.bf16.msra.mxu0 %v1348_v11  ;;  %1110 = vmatpush3.bf16.msra.mxu1 %v1348_v11 }
   0xd   :  { %1087 = vmatprep.subr.bf16.mxu0 %v1289_v0  ;;  %1111 = vmatprep.subr.bf16.mxu1 %v1289_v0 }
  0x10   :  { %1089 = vmatpush3.bf16.msra.mxu0 %v1360_v14  ;;  %1113 = vmatpush3.bf16.msra.mxu1 %v1360_v14 }
  0x11   :  { %1090 = vmatprep.subr.bf16.mxu0 %v1289_v0  ;;  %1114 = vmatprep.subr.bf16.mxu1 %v1289_v0 }
  0x14   :  { %1092 = vmatpush3.bf16.msra.mxu0 %v1372_v17  ;;  %1116 = vmatpush3.bf16.msra.mxu1 %v1372_v17 }
  0x15   :  { %1093 = vmatprep.subr.bf16.mxu0 %v1289_v0  ;;  %1117 = vmatprep.subr.bf16.mxu1 %v1289_v0 }
  0x18   :  { %1095 = vmatpush3.bf16.msra.mxu0 %v1384_v20  ;;  %1119 = vmatpush3.bf16.msra.mxu1 %v1384_v20 }
  0x19   :  { %1096 = vmatprep.subr.bf16.mxu0 %v1289_v0  ;;  %1120 = vmatprep.subr.bf16.mxu1 %v1289_v0 }
  0x1c   :  { %1098 = vmatpush3.bf16.msra.mxu0 %v1396_v23  ;;  %1122 = vmatpush3.bf16.msra.mxu1 %v1396_v23 }
  0x1d   :  { %1099 = vmatprep.subr.bf16.mxu0 %v1289_v0  ;;  %1123 = vmatprep.subr.bf16.mxu1 %v1289_v0 }
  0x20   :  { %1101 = vmatpush3.bf16.msra.mxu0 %v1408_v26  ;;  %1125 = vmatpush3.bf16.msra.mxu1 %v1408_v26 }
  0x21   :  { %1126 = vmatprep.subr.bf16.mxu0 %v1289_v0  ;;  %1150 = vmatprep.subr.bf16.mxu1 %v1289_v0 }
  0x23   :  { %831 = vmatmul.mubr.f32.vlgmr.msra.gmra.mrb[0].mxu0 %v36_v27 }
  0x24   :  { %1128 = vmatpush3.bf16.msra.mxu0 %v1324_v5  ;;  %900 = vmatprep.mubr.msk.f32.mxu0 %vm1290_vm0, %v1291_v4 }
  0x25   :  { %1129 = vmatprep.subr.bf16.mxu0 %v1289_v0 }
  0x28   :  { %1131 = vmatpush3.bf16.msra.mxu0 %v1333_v7 }
  0x29   :  { %1132 = vmatprep.subr.bf16.mxu0 %v1289_v0 }
  0x2c   :  { %1134 = vmatpush3.bf16.msra.mxu0 %v1348_v11 }
  0x2d   :  { %1135 = vmatprep.subr.bf16.mxu0 %v1289_v0 }
  0x30   :  { %1137 = vmatpush3.bf16.msra.mxu0 %v1360_v14 }
  0x31   :  { %1138 = vmatprep.subr.bf16.mxu0 %v1289_v0 }
  0x34   :  { %1140 = vmatpush3.bf16.msra.mxu0 %v1372_v17 }
  0x35   :  { %1141 = vmatprep.subr.bf16.mxu0 %v1289_v0 }
  0x38   :  { %1143 = vmatpush3.bf16.msra.mxu0 %v1384_v20 }
  0x39   :  { %1144 = vmatprep.subr.bf16.mxu0 %v1289_v0 }
  0x3c   :  { %1146 = vmatpush3.bf16.msra.mxu0 %v1396_v23 }
  0x3d   :  { %1147 = vmatprep.subr.bf16.mxu0 %v1289_v0 }
  0x40   :  { %1149 = vmatpush3.bf16.msra.mxu0 %v1408_v26 }
  0x41   :  { %1174 = vmatprep.subr.bf16.mxu0 %v1289_v0 }
  0xf6   :  { %v104_v29 = vpop.f32.mrb[0].mxu0 }
  0xf7   :  { %v108_v30 = vadd.f32 %v104_v29, %v37_v28  ;;  %v832_v31 = vpop.f32.mrb[1].mxu0 }
  0xf9   :  { %1273 = vtanh.f32 %v108_v30 }
 0x103   :  { %v1274_v32 = vpop.eup %1273 }
 0x104   :  { %110 = vst [vmem:[%s1574_s3] sm:$0x3] %v1274_v32  ;;  %866 = vmatmul.mubr.f32.vlgmr.msra.gmra.mrb[0].mxu1 %v1274_v32 }
 0x105   :  { %1152 = vmatpush3.bf16.msra.mxu1 %v1324_v5  ;;  %935 = vmatprep.mubr.msk.f32.mxu1 %vm1290_vm0, %v1291_v4 }
 0x106   :  { %1153 = vmatprep.subr.bf16.mxu1 %v1289_v0 }
 0x109   :  { %1155 = vmatpush3.bf16.msra.mxu1 %v1333_v7 }
 0x10a   :  { %1156 = vmatprep.subr.bf16.mxu1 %v1289_v0 }
 0x10d   :  { %1158 = vmatpush3.bf16.msra.mxu1 %v1348_v11 }
 0x10e   :  { %1159 = vmatprep.subr.bf16.mxu1 %v1289_v0 }
 0x111   :  { %1161 = vmatpush3.bf16.msra.mxu1 %v1360_v14 }
 0x112   :  { %1162 = vmatprep.subr.bf16.mxu1 %v1289_v0 }
 0x115   :  { %1164 = vmatpush3.bf16.msra.mxu1 %v1372_v17 }
 0x116   :  { %1165 = vmatprep.subr.bf16.mxu1 %v1289_v0 }
 0x119   :  { %1167 = vmatpush3.bf16.msra.mxu1 %v1384_v20 }
 0x11a   :  { %1168 = vmatprep.subr.bf16.mxu1 %v1289_v0 }
 0x11d   :  { %1170 = vmatpush3.bf16.msra.mxu1 %v1396_v23 }
 0x11e   :  { %1171 = vmatprep.subr.bf16.mxu1 %v1289_v0 }
 0x121   :  { %1173 = vmatpush3.bf16.msra.mxu1 %v1408_v26 }
 0x122   :  { %1198 = vmatprep.subr.bf16.mxu1 %v1289_v0 }
 0x1d7   :  { %v179_v34 = vpop.f32.mrb[0].mxu1 }
 0x1d8   :  { %v183_v35 = vadd.f32 %v648_v33, %v179_v34  ;;  %v867_v36 = vpop.f32.mrb[1].mxu1 }
 0x1da   :  { %1275 = vtanh.f32 %v183_v35 }
 0x1e4   :  { %v1276_v37 = vpop.eup %1275 }
 0x1e5   :  { %649 = vst [vmem:[%s1574_s3 + $0x2] sm:$0x3] %v1276_v37  ;;  %901 = vmatmul.mubr.f32.vlgmr.msra.gmra.mrb[2].mxu0 %v1276_v37 }
 0x1e6   :  { %1176 = vmatpush3.bf16.msra.mxu0 %v1324_v5  ;;  %970 = vmatprep.mubr.msk.f32.mxu0 %vm1290_vm0, %v1291_v4 }
 0x1e7   :  { %1177 = vmatprep.subr.bf16.mxu0 %v1289_v0 }
 0x1ea   :  { %1179 = vmatpush3.bf16.msra.mxu0 %v1333_v7 }
 0x1eb   :  { %1180 = vmatprep.subr.bf16.mxu0 %v1289_v0 }
 0x1ee   :  { %1182 = vmatpush3.bf16.msra.mxu0 %v1348_v11 }
 0x1ef   :  { %1183 = vmatprep.subr.bf16.mxu0 %v1289_v0 }
 0x1f2   :  { %1185 = vmatpush3.bf16.msra.mxu0 %v1360_v14 }
 0x1f3   :  { %1186 = vmatprep.subr.bf16.mxu0 %v1289_v0 }
 0x1f6   :  { %1188 = vmatpush3.bf16.msra.mxu0 %v1372_v17 }
 0x1f7   :  { %1189 = vmatprep.subr.bf16.mxu0 %v1289_v0 }
 0x1fa   :  { %1191 = vmatpush3.bf16.msra.mxu0 %v1384_v20 }
 0x1fb   :  { %1192 = vmatprep.subr.bf16.mxu0 %v1289_v0 }
 0x1fe   :  { %1194 = vmatpush3.bf16.msra.mxu0 %v1396_v23 }
 0x1ff   :  { %1195 = vmatprep.subr.bf16.mxu0 %v1289_v0 }
 0x202   :  { %1197 = vmatpush3.bf16.msra.mxu0 %v1408_v26 }
 0x203   :  { %1222 = vmatprep.subr.bf16.mxu0 %v1289_v0 }
 0x2b8   :  { %v255_v39 = vpop.f32.mrb[2].mxu0 }
 0x2b9   :  { %v259_v40 = vadd.f32 %v650_v38, %v255_v39  ;;  %v902_v41 = vpop.f32.mrb[3].mxu0 }
 0x2bb   :  { %1277 = vtanh.f32 %v259_v40 }
 0x2c5   :  { %v1278_v42 = vpop.eup %1277 }
 0x2c6   :  { %651 = vst [vmem:[%s1574_s3 + $0x4] sm:$0x3] %v1278_v42  ;;  %936 = vmatmul.mubr.f32.vlgmr.msra.gmra.mrb[2].mxu1 %v1278_v42 }
 0x2c7   :  { %1200 = vmatpush3.bf16.msra.mxu1 %v1324_v5  ;;  %1005 = vmatprep.mubr.msk.f32.mxu1 %vm1290_vm0, %v1291_v4 }
 0x2c8   :  { %1201 = vmatprep.subr.bf16.mxu1 %v1289_v0 }
 0x2cb   :  { %1203 = vmatpush3.bf16.msra.mxu1 %v1333_v7 }
 0x2cc   :  { %1204 = vmatprep.subr.bf16.mxu1 %v1289_v0 }
 0x2cf   :  { %1206 = vmatpush3.bf16.msra.mxu1 %v1348_v11 }
 0x2d0   :  { %1207 = vmatprep.subr.bf16.mxu1 %v1289_v0 }
 0x2d3   :  { %1209 = vmatpush3.bf16.msra.mxu1 %v1360_v14 }
 0x2d4   :  { %1210 = vmatprep.subr.bf16.mxu1 %v1289_v0 }
 0x2d7   :  { %1212 = vmatpush3.bf16.msra.mxu1 %v1372_v17 }
 0x2d8   :  { %1213 = vmatprep.subr.bf16.mxu1 %v1289_v0 }
 0x2db   :  { %1215 = vmatpush3.bf16.msra.mxu1 %v1384_v20 }
 0x2dc   :  { %1216 = vmatprep.subr.bf16.mxu1 %v1289_v0 }
 0x2df   :  { %1218 = vmatpush3.bf16.msra.mxu1 %v1396_v23 }
 0x2e0   :  { %1219 = vmatprep.subr.bf16.mxu1 %v1289_v0 }
 0x2e3   :  { %1221 = vmatpush3.bf16.msra.mxu1 %v1408_v26 }
 0x2e4   :  { %1246 = vmatprep.subr.bf16.mxu1 %v1289_v0 }
 0x399   :  { %v331_v44 = vpop.f32.mrb[2].mxu1 }
 0x39a   :  { %v335_v45 = vadd.f32 %v652_v43, %v331_v44  ;;  %v937_v46 = vpop.f32.mrb[3].mxu1 }
 0x39c   :  { %1279 = vtanh.f32 %v335_v45 }
 0x3a6   :  { %v1280_v47 = vpop.eup %1279 }
 0x3a7   :  { %653 = vst [vmem:[%s1574_s3 + $0x6] sm:$0x3] %v1280_v47  ;;  %971 = vmatmul.mubr.f32.vlgmr.msra.gmra.mrb[4].mxu0 %v1280_v47 }
 0x3a8   :  { %1224 = vmatpush3.bf16.msra.mxu0 %v1324_v5  ;;  %1040 = vmatprep.mubr.msk.f32.mxu0 %vm1290_vm0, %v1291_v4 }
 0x3a9   :  { %1225 = vmatprep.subr.bf16.mxu0 %v1289_v0 }
 0x3ac   :  { %1227 = vmatpush3.bf16.msra.mxu0 %v1333_v7 }
 0x3ad   :  { %1228 = vmatprep.subr.bf16.mxu0 %v1289_v0 }
 0x3b0   :  { %1230 = vmatpush3.bf16.msra.mxu0 %v1348_v11 }
 0x3b1   :  { %1231 = vmatprep.subr.bf16.mxu0 %v1289_v0 }
 0x3b4   :  { %1233 = vmatpush3.bf16.msra.mxu0 %v1360_v14 }
 0x3b5   :  { %1234 = vmatprep.subr.bf16.mxu0 %v1289_v0 }
 0x3b8   :  { %1236 = vmatpush3.bf16.msra.mxu0 %v1372_v17 }
 0x3b9   :  { %1237 = vmatprep.subr.bf16.mxu0 %v1289_v0 }
 0x3bc   :  { %1239 = vmatpush3.bf16.msra.mxu0 %v1384_v20 }
 0x3bd   :  { %1240 = vmatprep.subr.bf16.mxu0 %v1289_v0 }
 0x3c0   :  { %1242 = vmatpush3.bf16.msra.mxu0 %v1396_v23 }
 0x3c1   :  { %1243 = vmatprep.subr.bf16.mxu0 %v1289_v0 }
 0x3c4   :  { %1245 = vmatpush3.bf16.msra.mxu0 %v1408_v26 }
 0x47a   :  { %v407_v49 = vpop.f32.mrb[4].mxu0 }
 0x47b   :  { %v411_v50 = vadd.f32 %v654_v48, %v407_v49  ;;  %v972_v51 = vpop.f32.mrb[5].mxu0 }
 0x47d   :  { %1281 = vtanh.f32 %v411_v50 }
 0x487   :  { %v1282_v52 = vpop.eup %1281 }
 0x488   :  { %655 = vst [vmem:[%s1574_s3 + $0x8] sm:$0x3] %v1282_v52  ;;  %1006 = vmatmul.mubr.f32.vlgmr.msra.gmra.mrb[4].mxu1 %v1282_v52 }
 0x489   :  { %1248 = vmatpush3.bf16.msra.mxu1 %v1324_v5  ;;  %1075 = vmatprep.mubr.msk.f32.mxu1 %vm1290_vm0, %v1291_v4 }
 0x48a   :  { %1249 = vmatprep.subr.bf16.mxu1 %v1289_v0 }
 0x48d   :  { %1251 = vmatpush3.bf16.msra.mxu1 %v1333_v7 }
 0x48e   :  { %1252 = vmatprep.subr.bf16.mxu1 %v1289_v0 }
 0x491   :  { %1254 = vmatpush3.bf16.msra.mxu1 %v1348_v11 }
 0x492   :  { %1255 = vmatprep.subr.bf16.mxu1 %v1289_v0 }
 0x495   :  { %1257 = vmatpush3.bf16.msra.mxu1 %v1360_v14 }
 0x496   :  { %1258 = vmatprep.subr.bf16.mxu1 %v1289_v0 }
 0x499   :  { %1260 = vmatpush3.bf16.msra.mxu1 %v1372_v17 }
 0x49a   :  { %1261 = vmatprep.subr.bf16.mxu1 %v1289_v0 }
 0x49d   :  { %1263 = vmatpush3.bf16.msra.mxu1 %v1384_v20 }
 0x49e   :  { %1264 = vmatprep.subr.bf16.mxu1 %v1289_v0 }
 0x4a1   :  { %1266 = vmatpush3.bf16.msra.mxu1 %v1396_v23 }
 0x4a2   :  { %1267 = vmatprep.subr.bf16.mxu1 %v1289_v0 }
 0x4a5   :  { %1269 = vmatpush3.bf16.msra.mxu1 %v1408_v26 }
 0x55b   :  { %v483_v54 = vpop.f32.mrb[4].mxu1 }
 0x55c   :  { %v487_v55 = vadd.f32 %v656_v53, %v483_v54  ;;  %v1007_v56 = vpop.f32.mrb[5].mxu1 }
 0x55e   :  { %1283 = vtanh.f32 %v487_v55 }
 0x568   :  { %v1284_v57 = vpop.eup %1283 }
 0x569   :  { %657 = vst [vmem:[%s1574_s3 + $0xa] sm:$0x3] %v1284_v57  ;;  %1041 = vmatmul.mubr.f32.vlgmr.msra.gmra.mrb[6].mxu0 %v1284_v57 }
 0x63c   :  { %v559_v59 = vpop.f32.mrb[6].mxu0 }
 0x63d   :  { %v563_v60 = vadd.f32 %v658_v58, %v559_v59  ;;  %v1042_v61 = vpop.f32.mrb[7].mxu0 }
 0x63f   :  { %1285 = vtanh.f32 %v563_v60 }
 0x649   :  { %v1286_v62 = vpop.eup %1285 }
 0x64a   :  { %659 = vst [vmem:[%s1574_s3 + $0xc] sm:$0x3] %v1286_v62  ;;  %1076 = vmatmul.mubr.f32.vlgmr.msra.gmra.mrb[6].mxu1 %v1286_v62 }
 0x71d   :  { %v635_v0 = vpop.f32.mrb[6].mxu1 }
 0x71e   :  { %v639_v1 = vadd.f32 %v660_v63, %v635_v0  ;;  %v1077_v2 = vpop.f32.mrb[7].mxu1 }
 0x720   :  { %1287 = vtanh.f32 %v639_v1 }
 0x72a   :  { %v1288_v3 = vpop.eup %1287 }
 0x72b   :  { %661 = vst [vmem:[%s1574_s3 + $0xe] sm:$0x3] %v1288_v3  ;;  %643 = vst [vmem:[#allocation2] sm:$0x3] %v1288_v3 }

</bundles_post_ra>
